<compile_context>
chip_gen: v5e
topology: v5e:2x2
jax: 0.10.0
libtpu: 0.0.40
codegen_flags: <defaults>
</compile_context>

<pallas_src>
import functools

import jax
import jax.numpy as jnp
from jax.experimental import pallas as pl
from jax.experimental.pallas import tpu as pltpu

LANES = 128
SUBLANES = 8
MAX_CHUNK_ROWS = 1024      # rows per in-kernel compute chunk (caps f32 temps)
NUM_SPLITS = 2             # outer "parallel" grid axis (v7x has 2 TensorCores)


def _round_up(x, m):
    return ((x + m - 1) // m) * m


def _huber_kernel(x_ref, y_ref, out_ref, acc_ref, *,
                  delta, m_rows, tm, chunk, tiles_per_split):
    c = pl.program_id(0)           # split index (TensorCore on v7x)
    j = pl.program_id(1)           # tile index within this split's row range

    @pl.when(j == 0)
    def _():
        acc_ref[...] = jnp.zeros_like(acc_ref)

    tile_idx = c * tiles_per_split + j       # intended (unclamped) global tile
    tile_row0 = tile_idx * tm
    n_chunks = tm // chunk

    def make_body(apply_mask):
        def body(ci, carry):
            r0 = pl.multiple_of(ci * chunk, chunk)
            xv = x_ref[pl.ds(r0, chunk), :].astype(jnp.float32)
            yv = y_ref[pl.ds(r0, chunk), :].astype(jnp.float32)
            a = jnp.abs(xv - yv)
            m = jnp.minimum(a, delta)
            two_l = m * (2.0 * a - m)        # == 2 * delta^2 * smooth_l1(d)
            if apply_mask:
                rows = (tile_row0 + r0 +
                        jax.lax.broadcasted_iota(jnp.int32, (chunk, LANES), 0))
                # Select (not multiply): OOB VMEM in a ragged block may be NaN.
                two_l = jnp.where(rows < m_rows, two_l, 0.0)
            # Pure-VPU accumulation into an (8,128) vreg-shaped partial sum.
            acc_ref[...] += two_l.reshape(
                chunk // SUBLANES, SUBLANES, LANES).sum(axis=0)
            return carry
        return body

    is_full = (tile_row0 + tm) <= m_rows     # tile entirely inside valid rows

    @pl.when(is_full)
    def _():
        jax.lax.fori_loop(0, n_chunks, make_body(False), 0, unroll=True)

    @pl.when(jnp.logical_not(is_full))
    def _():
        jax.lax.fori_loop(0, n_chunks, make_body(True), 0, unroll=True)

    @pl.when(j == pl.num_programs(1) - 1)
    def _():
        out_ref[0] = acc_ref[...]            # unmasked full-vreg store


def huber_loss(x, x_hat, delta=1.0, *, tile_rows=8192):
    assert x.shape == x_hat.shape, "x and x_hat must have the same shape"
    if float(delta) <= 0.0:
        raise ValueError("HuberLoss: delta must be > 0")
    n_elems = x.size
    assert n_elems > 0, "inputs must be non-empty"

    xf = x.reshape(-1)
    yf = x_hat.reshape(-1)

    m_rows = pl.cdiv(n_elems, LANES)
    rem = n_elems % LANES
    if rem:
        # Pad only to the next 128-lane boundary (identical zeros on both
        # operands contribute exactly 0 loss).  No padding to tile multiples.
        # TODO(synk): a fully copy-free path for N % 128 != 0 would need a
        #             1-D / ANY-space tail kernel; not worth it here.
        pad = LANES - rem
        xf = jnp.pad(xf, (0, pad))
        yf = jnp.pad(yf, (0, pad))

    x2 = xf.reshape(m_rows, LANES)           # free reshape when rem == 0
    y2 = yf.reshape(m_rows, LANES)

    # Tile sizing: chunk (<=1024 rows, multiple of 16 so f32/bf16 tiles are
    # legal), tile = whole number of chunks capped at tile_rows.
    chunk = min(MAX_CHUNK_ROWS, _round_up(m_rows, 16), _round_up(tile_rows, 16))
    tm = max(1, min(_round_up(tile_rows, 16),
                    _round_up(m_rows, 16)) // chunk) * chunk

    num_tiles = pl.cdiv(m_rows, tm)
    num_splits = NUM_SPLITS if num_tiles >= NUM_SPLITS else 1
    tiles_per_split = pl.cdiv(num_tiles, num_splits)
    overshoot = num_splits * tiles_per_split - num_tiles    # 0 or 1

    def in_index_map(c, j):
        t = c * tiles_per_split + j
        if overshoot:
            # Clamp the (at most one) overshoot tile back in range; the kernel
            # masks its contribution to exactly 0.
            t = jnp.minimum(t, num_tiles - 1)
        return (t, 0)

    kernel = functools.partial(
        _huber_kernel,
        delta=float(delta),
        m_rows=int(m_rows),
        tm=int(tm),
        chunk=int(chunk),
        tiles_per_split=int(tiles_per_split),
    )

    itemsize = x.dtype.itemsize
    # Double-buffered inputs (2 operands x 2 buffers) + headroom for the
    # chunked f32 temporaries / outputs / scratch.  ~28 MiB at tm=8192 f32:
    # under v7x's 32 MiB default scoped limit and 64 MiB physical VMEM.
    vmem_limit = int(2 * 2 * tm * LANES * itemsize + (12 << 20))

    partials = pl.pallas_call(
        kernel,
        out_shape=jax.ShapeDtypeStruct((num_splits, SUBLANES, LANES),
                                       jnp.float32),
        grid_spec=pltpu.PrefetchScalarGridSpec(
            num_scalar_prefetch=0,
            grid=(num_splits, tiles_per_split),
            in_specs=[
                pl.BlockSpec((tm, LANES), in_index_map),
                pl.BlockSpec((tm, LANES), in_index_map),
            ],
            out_specs=pl.BlockSpec((1, SUBLANES, LANES),
                                   lambda c, j: (c, 0, 0)),
            scratch_shapes=[pltpu.VMEM((SUBLANES, LANES), jnp.float32)],
        ),
        compiler_params=pltpu.CompilerParams(
            dimension_semantics=("parallel", "arbitrary"),
            vmem_limit_bytes=vmem_limit,
        ),
        cost_estimate=pl.CostEstimate(
            flops=int(7 * n_elems),
            transcendentals=0,
            bytes_accessed=int(2 * n_elems * itemsize
                               + num_splits * SUBLANES * LANES * 4),
        ),
    )(x2, y2)

    # Single tiny cross-lane reduction + finalize: the 0.5 folds the 2x in the
    # per-element accumulation; delta^2 cancelled algebraically in-kernel.
    return jnp.sum(partials) * jnp.float32(0.5 / n_elems)


def huber_loss_ref(x, x_hat, delta=1.0):
    d = (x - x_hat) / delta
    ad = jnp.abs(d)
    l = jnp.where(ad < 1.0, 0.5 * d * d, ad - 0.5)
    return jnp.mean(l) * delta * delta


if __name__ == "__main__":
    key = jax.random.PRNGKey(0)
    k1, k2 = jax.random.split(key)

    # Small NCHW-style regression target.
    shape = (2, 4, 16, 16)
    x = jax.random.normal(k1, shape, dtype=jnp.float32) * 2.0
    x_hat = jax.random.normal(k2, shape, dtype=jnp.float32) * 2.0
    out = jax.block_until_ready(huber_loss(x, x_hat, delta=1.0))
    ref = huber_loss_ref(x, x_hat, delta=1.0)
    assert jnp.allclose(out, ref, rtol=2e-5, atol=1e-5), (out, ref)

    # Non-default delta and a size that is not a multiple of 128
    # (lane-boundary pad + ragged/masked block path).
    x3 = jax.random.normal(k1, (3, 5, 7), dtype=jnp.float32) * 4.0
    y3 = jax.random.normal(k2, (3, 5, 7), dtype=jnp.float32) * 4.0
    out3 = jax.block_until_ready(huber_loss(x3, y3, delta=2.0))
    ref3 = huber_loss_ref(x3, y3, delta=2.0)
    assert jnp.allclose(out3, ref3, rtol=2e-5, atol=1e-5), (out3, ref3)

    # Small-tile override: exercises the multi-tile grid, the 2-way split,
    # the clamped (overshoot) index map and the ragged-row mask path.
    x4 = jax.random.normal(k1, (4, 33, 130), dtype=jnp.float32) * 3.0
    y4 = jax.random.normal(k2, (4, 33, 130), dtype=jnp.float32) * 3.0
    out4 = jax.block_until_ready(huber_loss(x4, y4, delta=1.5, tile_rows=16))
    ref4 = huber_loss_ref(x4, y4, delta=1.5)
    assert jnp.allclose(out4, ref4, rtol=2e-5, atol=1e-5), (out4, ref4)

    print("KERNEL_OK")
</pallas_src>

<mosaic_0001>
module attributes {stable_mosaic.version = 11 : i64} {
  func.func @_huber_kernel(%arg0: i32, %arg1: i32, %arg2: memref<16x128xf32, #tpu.memory_space<vmem>>, %arg3: memref<16x128xf32, #tpu.memory_space<vmem>>, %arg4: memref<1x8x128xf32, #tpu.memory_space<vmem>>, %arg5: memref<8x128xf32, #tpu.memory_space<vmem>>) attributes {dimension_semantics = [#tpu.dimension_semantics<parallel>, #tpu.dimension_semantics<arbitrary>], iteration_bounds = array<i64: 1, 1>, scalar_prefetch = 0 : i64, scratch_operands = 1 : i64, tpu.core_type = #tpu.core_type<tc>, window_params = [{transform_indices = @transform_0, window_bounds = array<i64: 16, 128>}, {transform_indices = @transform_1, window_bounds = array<i64: 16, 128>}, {transform_indices = @transform_2, window_bounds = array<i64: 1, 8, 128>}]} {
    %c0_i32 = arith.constant 0 : i32
    %0 = arith.cmpi eq, %arg1, %c0_i32 : i32
    %1 = arith.extui %0 : i1 to i32
    %c0_i32_0 = arith.constant 0 : i32
    %2 = arith.cmpi ne, %1, %c0_i32_0 : i32
    scf.if %2 {
      %cst = arith.constant 0.000000e+00 : f32
      %16 = vector.broadcast %cst : f32 to vector<8x128xf32>
      %c0 = arith.constant 0 : index
      %c0_7 = arith.constant 0 : index
      %17 = vector.load %arg5[%c0, %c0_7] : memref<8x128xf32, #tpu.memory_space<vmem>>, vector<8x128xf32>
      tpu.vector_store %arg5[%c0, %c0_7], %16 {strides = array<i32>} : memref<8x128xf32, #tpu.memory_space<vmem>>, vector<8x128xf32>,
    } else {
    }
    %c1_i32 = arith.constant 1 : i32
    %3 = arith.muli %arg0, %c1_i32 : i32
    %4 = arith.addi %3, %arg1 : i32
    %c16_i32 = arith.constant 16 : i32
    %5 = arith.muli %4, %c16_i32 : i32
    %c16_i32_1 = arith.constant 16 : i32
    %6 = arith.addi %5, %c16_i32_1 : i32
    %c16_i32_2 = arith.constant 16 : i32
    %7 = arith.cmpi sle, %6, %c16_i32_2 : i32
    %8 = arith.extui %7 : i1 to i32
    %c0_i32_3 = arith.constant 0 : i32
    %9 = arith.cmpi ne, %8, %c0_i32_3 : i32
    scf.if %9 {
      %c0_i32_7 = arith.constant 0 : i32
      %c16_i32_8 = arith.constant 16 : i32
      %16 = arith.muli %c0_i32_7, %c16_i32_8 : i32
      %17 = tpu.assume_multiple %16, 16 : i32
      %18 = arith.index_cast %17 : i32 to index
      %c0 = arith.constant 0 : index
      %19 = vector.load %arg2[%18, %c0] : memref<16x128xf32, #tpu.memory_space<vmem>>, vector<16x128xf32>
      %20 = arith.index_cast %17 : i32 to index
      %c0_9 = arith.constant 0 : index
      %21 = vector.load %arg3[%20, %c0_9] : memref<16x128xf32, #tpu.memory_space<vmem>>, vector<16x128xf32>
      %22 = arith.subf %19, %21 : vector<16x128xf32>
      %23 = math.absf %22 : vector<16x128xf32>
      %cst = arith.constant 1.000000e+00 : f32
      %24 = vector.broadcast %cst : f32 to vector<16x128xf32>
      %25 = arith.minimumf %23, %24 : vector<16x128xf32>
      %cst_10 = arith.constant 2.000000e+00 : f32
      %26 = vector.broadcast %cst_10 : f32 to vector<16x128xf32>
      %27 = arith.mulf %26, %23 : vector<16x128xf32>
      %28 = arith.subf %27, %25 : vector<16x128xf32>
      %29 = arith.mulf %25, %28 : vector<16x128xf32>
      %c0_11 = arith.constant 0 : index
      %c0_12 = arith.constant 0 : index
      %30 = vector.load %arg5[%c0_11, %c0_12] : memref<8x128xf32, #tpu.memory_space<vmem>>, vector<8x128xf32>
      %31 = vector.shape_cast %29 : vector<16x128xf32> to vector<2x8x128xf32>
      %cst_13 = arith.constant dense<0.000000e+00> : vector<8x128xf32>
      %32 = vector.multi_reduction <add>, %31, %cst_13 [0] : vector<2x8x128xf32> to vector<8x128xf32>
      %33 = arith.addf %30, %32 : vector<8x128xf32>
      %c0_14 = arith.constant 0 : index
      %c0_15 = arith.constant 0 : index
      %34 = vector.load %arg5[%c0_14, %c0_15] : memref<8x128xf32, #tpu.memory_space<vmem>>, vector<8x128xf32>
      tpu.vector_store %arg5[%c0_14, %c0_15], %33 {strides = array<i32>} : memref<8x128xf32, #tpu.memory_space<vmem>>, vector<8x128xf32>,
      %c1_i32_16 = arith.constant 1 : i32
    } else {
    }
    %true = arith.constant true
    %10 = arith.xori %7, %true : i1
    %11 = arith.extui %10 : i1 to i32
    %c0_i32_4 = arith.constant 0 : i32
    %12 = arith.cmpi ne, %11, %c0_i32_4 : i32
    scf.if %12 {
      %c0_i32_7 = arith.constant 0 : i32
      %c16_i32_8 = arith.constant 16 : i32
      %16 = arith.muli %c0_i32_7, %c16_i32_8 : i32
      %17 = tpu.assume_multiple %16, 16 : i32
      %18 = arith.index_cast %17 : i32 to index
      %c0 = arith.constant 0 : index
      %19 = vector.load %arg2[%18, %c0] : memref<16x128xf32, #tpu.memory_space<vmem>>, vector<16x128xf32>
      %20 = arith.index_cast %17 : i32 to index
      %c0_9 = arith.constant 0 : index
      %21 = vector.load %arg3[%20, %c0_9] : memref<16x128xf32, #tpu.memory_space<vmem>>, vector<16x128xf32>
      %22 = arith.subf %19, %21 : vector<16x128xf32>
      %23 = math.absf %22 : vector<16x128xf32>
      %cst = arith.constant 1.000000e+00 : f32
      %24 = vector.broadcast %cst : f32 to vector<16x128xf32>
      %25 = arith.minimumf %23, %24 : vector<16x128xf32>
      %cst_10 = arith.constant 2.000000e+00 : f32
      %26 = vector.broadcast %cst_10 : f32 to vector<16x128xf32>
      %27 = arith.mulf %26, %23 : vector<16x128xf32>
      %28 = arith.subf %27, %25 : vector<16x128xf32>
      %29 = arith.mulf %25, %28 : vector<16x128xf32>
      %30 = arith.addi %5, %17 : i32
      %31 = tpu.iota {dimensions = array<i32: 0>} : vector<16x128xi32>
      %32 = vector.broadcast %30 : i32 to vector<16x128xi32>
      %33 = arith.addi %32, %31 : vector<16x128xi32>
      %c16_i32_11 = arith.constant 16 : i32
      %34 = vector.broadcast %c16_i32_11 : i32 to vector<16x128xi32>
      %35 = arith.cmpi slt, %33, %34 : vector<16x128xi32>
      %cst_12 = arith.constant 0.000000e+00 : f32
      %36 = vector.broadcast %cst_12 : f32 to vector<16x128xf32>
      %37 = arith.select %35, %29, %36 : vector<16x128xi1>, vector<16x128xf32>
      %c0_13 = arith.constant 0 : index
      %c0_14 = arith.constant 0 : index
      %38 = vector.load %arg5[%c0_13, %c0_14] : memref<8x128xf32, #tpu.memory_space<vmem>>, vector<8x128xf32>
      %39 = vector.shape_cast %37 : vector<16x128xf32> to vector<2x8x128xf32>
      %cst_15 = arith.constant dense<0.000000e+00> : vector<8x128xf32>
      %40 = vector.multi_reduction <add>, %39, %cst_15 [0] : vector<2x8x128xf32> to vector<8x128xf32>
      %41 = arith.addf %38, %40 : vector<8x128xf32>
      %c0_16 = arith.constant 0 : index
      %c0_17 = arith.constant 0 : index
      %42 = vector.load %arg5[%c0_16, %c0_17] : memref<8x128xf32, #tpu.memory_space<vmem>>, vector<8x128xf32>
      tpu.vector_store %arg5[%c0_16, %c0_17], %41 {strides = array<i32>} : memref<8x128xf32, #tpu.memory_space<vmem>>, vector<8x128xf32>,
      %c1_i32_18 = arith.constant 1 : i32
    } else {
    }
    %c0_i32_5 = arith.constant 0 : i32
    %13 = arith.cmpi eq, %arg1, %c0_i32_5 : i32
    %14 = arith.extui %13 : i1 to i32
    %c0_i32_6 = arith.constant 0 : i32
    %15 = arith.cmpi ne, %14, %c0_i32_6 : i32
    scf.if %15 {
      %c0 = arith.constant 0 : index
      %c0_7 = arith.constant 0 : index
      %16 = vector.load %arg5[%c0, %c0_7] : memref<8x128xf32, #tpu.memory_space<vmem>>, vector<8x128xf32>
      %c0_8 = arith.constant 0 : index
      %c0_9 = arith.constant 0 : index
      %c0_10 = arith.constant 0 : index
      %17 = vector.load %arg4[%c0_8, %c0_9, %c0_10] : memref<1x8x128xf32, #tpu.memory_space<vmem>>, vector<1x8x128xf32>
      %18 = vector.shape_cast %17 : vector<1x8x128xf32> to vector<8x128xf32>
      %19 = vector.shape_cast %16 : vector<8x128xf32> to vector<1x8x128xf32>
      tpu.vector_store %arg4[%c0_8, %c0_9, %c0_10], %19 {strides = array<i32>} : memref<1x8x128xf32, #tpu.memory_space<vmem>>, vector<1x8x128xf32>,
    } else {
    }
    return
  }
  func.func @transform_0(%arg0: i32, %arg1: i32) -> (i32, i32) {
    %c1_i32 = arith.constant 1 : i32
    %0 = arith.muli %arg0, %c1_i32 : i32
    %1 = arith.addi %0, %arg1 : i32
    %c0_i32 = arith.constant 0 : i32
    %c0_i32_0 = arith.constant 0 : i32
    return %1, %c0_i32 : i32, i32
  }
  func.func @transform_1(%arg0: i32, %arg1: i32) -> (i32, i32) {
    %c1_i32 = arith.constant 1 : i32
    %0 = arith.muli %arg0, %c1_i32 : i32
    %1 = arith.addi %0, %arg1 : i32
    %c0_i32 = arith.constant 0 : i32
    %c0_i32_0 = arith.constant 0 : i32
    return %1, %c0_i32 : i32, i32
  }
  func.func @transform_2(%arg0: i32, %arg1: i32) -> (i32, i32, i32) {
    %c0_i32 = arith.constant 0 : i32
    %c0_i32_0 = arith.constant 0 : i32
    %c0_i32_1 = arith.constant 0 : i32
    return %arg0, %c0_i32, %c0_i32_0 : i32, i32, i32
  }
}

</mosaic_0001>

<bundles_post_ra>
// kernel: tpu_custom_call.1
= control target key start
LH: loop header
LB: loop body
LE: loop exit
PB: predicated region body
PF: predicated region fallthrough
CT: control target
= control target key end

     0   :  { %7 = vsyncpa [#allocation4], 0  ;;  %s258_s0 = inlined_call_operand.hbm [shape: f32[16,128], index: 0, kind: input, shape index: {}]   ;;  %s259_s1 = inlined_call_operand.hbm [shape: f32[16,128], index: 1, kind: input, shape index: {}]   ;;  %s260_s2 = inlined_call_operand.hbm [shape: f32[1,8,128], index: 2, kind: output, shape index: {}]  }
   0x1   :  { %8 = vsyncpa [#allocation7], 0 }
   0x2   :  { %9 = vsyncpa [#allocation5], 0  ;;  %s18_s11 = sshll.u32 %s258_s0, 4  ;;  %s229_s12 = smov [#allocation3]   ;;  %s19_s11 = int_to_ptr.hbm [resolvable:$true] %s18_s11 }
   0x3   :  { %s20_s13 = sshll.u32 %s229_s12, 4  ;;  %s35_s16 = sshll.u32 %s259_s1, 4  ;;  %s21_s13 = int_to_ptr.vmem [resolvable:$true] %s20_s13  ;;  %s36_s16 = int_to_ptr.hbm [resolvable:$true] %s35_s16 }
   0x4   :  { %s230_s17 = smov 128   ;;  %s231_s18 = smov 8  }
   0x5   :  { %26 = dma.hbm_to_vmem [thread:$0]  %s19_s11, 256, %s21_s13, [#allocation4], %s230_s17, %s230_s17, %s231_s18  }
   0x6   :  { %s232_s19 = smov [#allocation6]  }
   0x7   :  { %s37_s20 = sshll.u32 %s232_s19, 4  ;;  %s38_s20 = int_to_ptr.vmem [resolvable:$true] %s37_s20 }
   0x8   :  { %43 = dma.hbm_to_vmem [thread:$0]  %s36_s16, 256, %s38_s20, [#allocation7], %s230_s17, %s230_s17, %s231_s18  }
   0x9   :  { %223 = dma.done.wait [#allocation4], 256  }
   0xa   :  { %224 = vsyncadd [#allocation4], 4294967040 }
   0xb   :  { %225 = dma.done.wait [#allocation7], 256  }
   0xc   :  { %226 = vsyncadd [#allocation7], 4294967040  ;;  %v68_v0 = vld [vmem:[#allocation3] sm:$0xff]  ;;  %v69_v1 = vld [vmem:[#allocation3 + $0x8] sm:$0xff]  ;;  %s233_s0 = smov [#allocation8]   ;;  %s135_s23 = sshll.u32 %s260_s2, 4  ;;  %s136_s23 = int_to_ptr.hbm [resolvable:$true] %s135_s23 }
   0xd   :  { %v70_v2 = vld [vmem:[#allocation6] sm:$0xff]  ;;  %v71_v3 = vld [vmem:[#allocation6 + $0x8] sm:$0xff]  ;;  %s133_s1 = sshll.u32 %s233_s0, 4  ;;  %s134_s1 = int_to_ptr.vmem [resolvable:$true] %s133_s1 }
   0xe   :  { %v72_v4 = vsub.f32 %v68_v0, %v70_v2  ;;  %v73_v5 = vsub.f32 %v69_v1, %v71_v3 }
  0x10   :  { %v74_v6 = vand.u32 2147483647, %v72_v4  ;;  %v75_v7 = vand.u32 2147483647, %v73_v5 }
  0x12   :  { %v76_v8 = vmin.f32 %v74_v6, 1.0  ;;  %v78_v9 = vmul.f32 2.0, %v74_v6  ;;  %v77_v10 = vmin.f32 %v75_v7, 1.0  ;;  %v79_v11 = vmul.f32 2.0, %v75_v7 }
  0x14   :  { %v80_v12 = vsub.f32 %v78_v9, %v76_v8  ;;  %v81_v13 = vsub.f32 %v79_v11, %v77_v10 }
  0x16   :  { %v82_v14 = vmul.f32 %v80_v12, %v76_v8  ;;  %v83_v15 = vmul.f32 %v81_v13, %v77_v10 }
  0x18   :  { %v85_v16 = vadd.f32 %v83_v15, %v82_v14 }
  0x1a   :  { %127 = vst [vmem:[#allocation8] sm:$0xff] %v85_v16 }
  0x1b   :  { %138 = dma.vmem_to_hbm [thread:$0]  %s134_s1, 128, %s136_s23, [#allocation5]  }
  0x1c   :  { %227 = dma.done.wait [#allocation5], 128  }
  0x1d   :  { %228 = vsyncadd [#allocation5], 4294967168 }
  0x1e   :  { %143 = vsyncpa [#allocation4], 1 }
  0x1f   :  { %144 = vsyncpa [#allocation7], 1 }
  0x20   :  { %145 = vsyncpa [#allocation5], 1 }

</bundles_post_ra>
